<compile_context>
chip_gen: v7x
topology: tpu7x:2x2x1
jax: 0.10.0
libtpu: 0.0.40
codegen_flags: <defaults>
</compile_context>

<pallas_src>
from typing import Tuple

import jax
import jax.numpy as jnp
from jax.experimental import pallas as pl
from jax.experimental.pallas import tpu as pltpu


_LANE = 128      # lane width (last dim)
_SUBLANE = 8     # f32 sublane (second-to-last dim)


def _round_up(x: int, m: int) -> int:
    return ((x + m - 1) // m) * m


# ----------------------------- Pallas kernel --------------------------------

def _linear_kernel(x_ref, w_ref, b_ref, o_ref):
    # x_ref: (TB, K), w_ref: (K, S_pad), b_ref: (1, S_pad), o_ref: (TB, S_pad)
    acc = jnp.dot(x_ref[...], w_ref[...], preferred_element_type=jnp.float32)
    o_ref[...] = (acc + b_ref[...]).astype(o_ref.dtype)


def linear_pallas(x: jax.Array, w_kspad: jax.Array, b_1spad: jax.Array,
                  num_valid_out: int, *, block_b: int = 128) -> jax.Array:
    """y = x @ W + b with a lane-padded output slab; returns (B, num_valid_out).

    x:        (B, K) float32
    w_kspad:  (K, S_pad) float32  -- transposed + zero-padded to lanes at init
    b_1spad:  (1, S_pad) float32  -- reshaped + zero-padded to lanes at init
    """
    B, K = x.shape
    K2, S_pad = w_kspad.shape
    assert K == K2 and S_pad % _LANE == 0

    # Batch tile: multiple of the f32 sublane, no bigger than needed.
    tb = min(_round_up(B, _SUBLANE), _round_up(block_b, _SUBLANE))
    b_pad = _round_up(B, tb)
    if b_pad != B:
        x = jnp.pad(x, ((0, b_pad - B), (0, 0)))

    out = pl.pallas_call(
        _linear_kernel,
        out_shape=jax.ShapeDtypeStruct((b_pad, S_pad), jnp.float32),
        grid=(b_pad // tb,),
        in_specs=[
            pl.BlockSpec((tb, K), lambda i: (i, 0)),     # x tile streams per step
            pl.BlockSpec((K, S_pad), lambda i: (0, 0)),  # W stays VMEM-resident
            pl.BlockSpec((1, S_pad), lambda i: (0, 0)),  # bias stays VMEM-resident
        ],
        out_specs=pl.BlockSpec((tb, S_pad), lambda i: (i, 0)),
        compiler_params=pltpu.CompilerParams(
            dimension_semantics=("parallel",)),
    )(x, w_kspad, b_1spad)

    return out[:B, :num_valid_out]


# ------------------------------ FixedNormal (JAX) ----------------------------

class FixedNormal:
    """JAX equivalent of the torch FixedNormal (diagonal Gaussian)."""

    def __init__(self, mean: jax.Array, std: jax.Array):
        self.mean = mean
        self.std = std

    def mode(self) -> jax.Array:
        return self.mean

    def sample(self, key: jax.Array) -> jax.Array:
        return self.mean + self.std * jax.random.normal(
            key, self.mean.shape, dtype=self.mean.dtype)

    def log_probs(self, actions: jax.Array) -> jax.Array:
        var = self.std * self.std
        lp = (-(actions - self.mean) ** 2 / (2.0 * var)
              - jnp.log(self.std)
              - 0.5 * jnp.log(2.0 * jnp.pi))
        return lp.sum(-1, keepdims=True)                          # (B, 1)

    def entropy(self) -> jax.Array:
        ent = 0.5 + 0.5 * jnp.log(2.0 * jnp.pi) + jnp.log(self.std)
        return ent.sum(-1)                                        # (B,)


# -------------------------------- DiagGaussian -------------------------------

def _orthogonal(key: jax.Array, shape: Tuple[int, int], gain: float) -> jax.Array:
    """Deterministic orthogonal init (same semantics as nn.init.orthogonal_)."""
    rows, cols = shape
    n = max(rows, cols)
    a = jax.random.normal(key, (n, n), dtype=jnp.float32)
    q, r = jnp.linalg.qr(a)
    q = q * jnp.sign(jnp.diag(r))[None, :]
    return gain * q[:rows, :cols]


class DiagGaussian:
    def __init__(self, num_inputs: int, num_outputs: int, key: jax.Array):
        self.num_outputs = num_outputs
        s_pad = _round_up(num_outputs, _LANE)
        # torch nn.Linear weight layout is (num_outputs, num_inputs); transpose
        # + lane-pad ONCE here (no per-call weight.T / bias.reshape).
        w = _orthogonal(key, (num_outputs, num_inputs), gain=1.0)
        self.weight = (jnp.zeros((num_inputs, s_pad), jnp.float32)
                       .at[:, :num_outputs].set(w.T))             # (K, S_pad)
        self.bias = jnp.zeros((1, s_pad), jnp.float32)            # (1, S_pad)
        # AddBias parameter (log-std), initialized to zeros like the torch code.
        self.logstd = jnp.zeros((num_outputs,), jnp.float32)

    def __call__(self, x: jax.Array) -> FixedNormal:
        action_mean = linear_pallas(x, self.weight, self.bias, self.num_outputs)
        # AddBias(zeros_like(action_mean)) == broadcast of the logstd parameter.
        action_logstd = jnp.broadcast_to(self.logstd, action_mean.shape)
        return FixedNormal(action_mean, jnp.exp(action_logstd))


# ----------------------------------- main ------------------------------------

if __name__ == "__main__":
    key = jax.random.PRNGKey(0)
    k_param, k_x, k_x2, k_sample = jax.random.split(key, 4)

    B, num_inputs, num_outputs = 8, 32, 6
    module = DiagGaussian(num_inputs, num_outputs, k_param)
    x = jax.random.normal(k_x, (B, num_inputs), dtype=jnp.float32)

    dist = module(x)
    ent = dist.entropy()
    mode = dist.mode()
    samp = dist.sample(k_sample)
    lp = dist.log_probs(samp)
    jax.block_until_ready((ent, mode, samp, lp))

    # sanity check the Pallas linear against plain JAX (single-tile path)
    ref = x @ module.weight[:, :num_outputs] + module.bias[0, :num_outputs]
    got = linear_pallas(x, module.weight, module.bias, num_outputs)
    assert jnp.allclose(ref, got, atol=1e-5, rtol=1e-5)

    # exercise the multi-tile / batch-padding path (grid > 1, B not tile-aligned)
    B2 = 200
    x2 = jax.random.normal(k_x2, (B2, num_inputs), dtype=jnp.float32)
    ref2 = x2 @ module.weight[:, :num_outputs] + module.bias[0, :num_outputs]
    got2 = linear_pallas(x2, module.weight, module.bias, num_outputs)
    assert got2.shape == (B2, num_outputs)
    assert jnp.allclose(ref2, got2, atol=1e-5, rtol=1e-5)

    assert mode.shape == (B, num_outputs)
    assert ent.shape == (B,)
    assert samp.shape == (B, num_outputs)
    assert lp.shape == (B, 1)

    print("KERNEL_OK")
</pallas_src>

<mosaic_0001>
module attributes {stable_mosaic.version = 11 : i64} {
  func.func @_linear_kernel(%arg0: i32, %arg1: memref<8x32xf32, #tpu.memory_space<vmem>>, %arg2: memref<32x128xf32, #tpu.memory_space<vmem>>, %arg3: memref<1x128xf32, #tpu.memory_space<vmem>>, %arg4: memref<8x128xf32, #tpu.memory_space<vmem>>) attributes {dimension_semantics = [#tpu.dimension_semantics<parallel>], iteration_bounds = array<i64: 1>, scalar_prefetch = 0 : i64, scratch_operands = 0 : i64, tpu.core_type = #tpu.core_type<tc>, window_params = [{transform_indices = @transform_0, window_bounds = array<i64: 8, 32>}, {pipeline_mode = #tpu.pipeline_mode<synchronous>, transform_indices = @transform_1, window_bounds = array<i64: 32, 128>}, {pipeline_mode = #tpu.pipeline_mode<synchronous>, transform_indices = @transform_2, window_bounds = array<i64: 1, 128>}, {transform_indices = @transform_3, window_bounds = array<i64: 8, 128>}]} {
    %c0 = arith.constant 0 : index
    %c0_0 = arith.constant 0 : index
    %0 = vector.load %arg1[%c0, %c0_0] : memref<8x32xf32, #tpu.memory_space<vmem>>, vector<8x32xf32>
    %c0_1 = arith.constant 0 : index
    %c0_2 = arith.constant 0 : index
    %1 = vector.load %arg2[%c0_1, %c0_2] : memref<32x128xf32, #tpu.memory_space<vmem>>, vector<32x128xf32>
    %cst = arith.constant dense<0.000000e+00> : vector<8x128xf32>
    %2 = tpu.matmul %0, %1, %cst {dimension_numbers = #tpu.dot_dimension_numbers<[1], [0], [0], [1], [0, 0, 1, 1], [], []>} : vector<8x32xf32>, vector<32x128xf32>, vector<8x128xf32> -> vector<8x128xf32>
    %c0_3 = arith.constant 0 : index
    %c0_4 = arith.constant 0 : index
    %3 = vector.load %arg3[%c0_3, %c0_4] : memref<1x128xf32, #tpu.memory_space<vmem>>, vector<1x128xf32>
    %4 = vector.broadcast %3 : vector<1x128xf32> to vector<8x128xf32>
    %5 = arith.addf %2, %4 : vector<8x128xf32>
    %c0_5 = arith.constant 0 : index
    %c0_6 = arith.constant 0 : index
    %6 = vector.load %arg4[%c0_5, %c0_6] : memref<8x128xf32, #tpu.memory_space<vmem>>, vector<8x128xf32>
    tpu.vector_store %arg4[%c0_5, %c0_6], %5 {strides = array<i32>} : memref<8x128xf32, #tpu.memory_space<vmem>>, vector<8x128xf32>,
    return
  }
  func.func @transform_0(%arg0: i32) -> (i32, i32) {
    %c0_i32 = arith.constant 0 : i32
    %c0_i32_0 = arith.constant 0 : i32
    return %arg0, %c0_i32 : i32, i32
  }
  func.func @transform_1(%arg0: i32) -> (i32, i32) {
    %c0_i32 = arith.constant 0 : i32
    %c0_i32_0 = arith.constant 0 : i32
    %c0_i32_1 = arith.constant 0 : i32
    return %c0_i32, %c0_i32_0 : i32, i32
  }
  func.func @transform_2(%arg0: i32) -> (i32, i32) {
    %c0_i32 = arith.constant 0 : i32
    %c0_i32_0 = arith.constant 0 : i32
    %c0_i32_1 = arith.constant 0 : i32
    return %c0_i32, %c0_i32_0 : i32, i32
  }
  func.func @transform_3(%arg0: i32) -> (i32, i32) {
    %c0_i32 = arith.constant 0 : i32
    %c0_i32_0 = arith.constant 0 : i32
    return %arg0, %c0_i32 : i32, i32
  }
}

</mosaic_0001>

<bundles_post_ra>
// kernel: tpu_custom_call.1
= control target key start
LH: loop header
LB: loop body
LE: loop exit
PB: predicated region body
PF: predicated region fallthrough
CT: control target
= control target key end

     0   :  { %8 = vsyncpa [#allocation3], 0  ;;  %s322_s0 = inlined_call_operand.hbm [shape: f32[8,32], index: 0, kind: input, shape index: {}]   ;;  %s323_s1 = inlined_call_operand.hbm [shape: f32[32,128], index: 1, kind: input, shape index: {}]   ;;  %s324_s2 = inlined_call_operand.vmem [shape: f32[1,128], index: 2, kind: input, shape index: {}]   ;;  %s325_s3 = inlined_call_operand.hbm [shape: f32[8,128], index: 3, kind: output, shape index: {}]  }
   0x1   :  { %9 = vsyncpa [#allocation6], 0 }
   0x2   :  { %10 = vsyncpa [#allocation4], 0  ;;  %s248_s12 = smov [#allocation2]   ;;  %s249_s14 = smov [#allocation5]  }
   0x3   :  { %s17_s13 = sshll.u32 %s248_s12, 4  ;;  %s26_s15 = sshll.u32 %s249_s14, 4  ;;  %s18_s13 = int_to_ptr.vmem [resolvable:$true] %s17_s13  ;;  %s276_s15 = int_to_ptr.vmem [resolvable:$true] %s26_s15 }
   0x4   :  { %s176_s18 = scalar_lea.hbm %s322_s0, 128 }
   0x5   :  { %p177_p0 = scmp.ne.s32.totalorder %s322_s0, %s176_s18  ;;  %p180_p1 = scmp.lt.u32.totalorder %s176_s18, %s322_s0 }
   0x7   :  { %p182_p2 = pnand %p180_p1, %p177_p0 }
   0x9   :  { %185 = shalt.err (!%p182_p2)
}
   0xa   :  { %s186_s23 = scalar_lea.vmem %s18_s13, 128  ;;  %p191_p4 = scmp.lt.s32.totalorder %s18_s13, %s18_s13 }
   0xb   :  { %p187_p3 = scmp.ne.s32.totalorder %s18_s13, %s186_s23  ;;  %p192_p5 = scmp.lt.s32.totalorder %s186_s23, %s186_s23 }
   0xd   :  { %p193_p6 = por %p192_p5, %p191_p4 }
   0xf   :  { %p194_p7 = pnand %p193_p6, %p187_p3 }
  0x11   :  { %197 = shalt.err (!%p194_p7)
}
  0x12   :  { %20 = dma.hbm_to_vmem [thread:$0]  %s322_s0, 128, %s18_s13, [#allocation3]  }
  0x13   :  { %s198_s28 = scalar_lea.hbm %s323_s1, 512 }
  0x14   :  { %p199_p8 = scmp.ne.s32.totalorder %s323_s1, %s198_s28  ;;  %p202_p9 = scmp.lt.u32.totalorder %s198_s28, %s323_s1 }
  0x16   :  { %p204_p10 = pnand %p202_p9, %p199_p8 }
  0x18   :  { %207 = shalt.err (!%p204_p10)
}
  0x19   :  { %s208_s6 = scalar_lea.vmem %s276_s15, 512  ;;  %p213_p12 = scmp.lt.s32.totalorder %s276_s15, %s276_s15 }
  0x1a   :  { %p209_p11 = scmp.ne.s32.totalorder %s276_s15, %s208_s6  ;;  %p214_p13 = scmp.lt.s32.totalorder %s208_s6, %s208_s6 }
  0x1c   :  { %p215_p0 = por %p214_p13, %p213_p12 }
  0x1e   :  { %p216_p1 = pnand %p215_p0, %p209_p11 }
  0x20   :  { %219 = shalt.err (!%p216_p1)
}
  0x21   :  { %s250_s0 = smov 128   ;;  %s251_s7 = smov 8  }
  0x22   :  { %32 = dma.hbm_to_vmem [thread:$0]  %s323_s1, 512, %s276_s15, [#allocation6], %s250_s0, %s250_s0, %s251_s7  }
  0x23   :  { %242 = dma.done.wait [#allocation3], 128  }
  0x24   :  { %243 = vsyncadd [#allocation3], 4294967168 }
  0x25   :  { %244 = dma.done.wait [#allocation6], 512  }
  0x26   :  { %245 = vsyncadd [#allocation6], 4294966784  ;;  %v252_v0 = vmov 0.0|0.0   ;;  %vm253_vm0 = vmmov 0   ;;  %v254_v1 = vmov 0.0   ;;  %v42_v2 = vld [vmem:[#allocation5] sm:$0xff] }
  0x27   :  { %162 = vmatprep.subr.bf16.mxu0 %v252_v0  ;;  %159 = vmatprep.mubr.msk.f32.mxu0 %vm253_vm0, %v254_v1  ;;  %v43_v3 = vld [vmem:[#allocation5 + $0x8] sm:$0xff]  ;;  %v44_v4 = vld [vmem:[#allocation5 + $0x10] sm:$0xff]  ;;  %v45_v6 = vld [vmem:[#allocation5 + $0x18] sm:$0xff]  ;;  %vm53_vm1 = vcmask 261120   ;;  %s255_s11 = smov [#allocation7]  }
  0x28   :  { %v163_v5 = vpack.c.bf16 %v43_v3, %v42_v2  ;;  %v166_v7 = vpack.c.bf16 %v45_v6, %v44_v4  ;;  %v41_v8 = vld [vmem:[#allocation2] sm:$0xff]  ;;  %s134_s12 = sshll.u32 %s255_s11, 4  ;;  %s135_s12 = int_to_ptr.vmem [resolvable:$true] %s134_s12 }
  0x29   :  { %v144_v9 = vld [vmem:[%s324_s2] ss:$0 sm:$0xff]  ;;  %s220_s13 = scalar_lea.vmem %s135_s12, 128  ;;  %p225_p3 = scmp.lt.s32.totalorder %s135_s12, %s135_s12 }
  0x2a   :  { %164 = vmatpush3.bf16.msra.mxu0 %v163_v5  ;;  %p221_p2 = scmp.ne.s32.totalorder %s135_s12, %s220_s13  ;;  %p226_p4 = scmp.lt.s32.totalorder %s220_s13, %s220_s13 }
  0x2b   :  { %165 = vmatprep.subr.bf16.mxu0 %v252_v0 }
  0x2c   :  { %p227_p5 = por %p226_p4, %p225_p3 }
  0x2e   :  { %167 = vmatpush3.bf16.msra.mxu0 %v166_v7  ;;  %p228_p6 = pnand %p227_p5, %p221_p2 }
  0x31   :  { %160 = vmatmul.mubr.msk.f32.vlgmr.msra.gmra.mrb[0].mxu0 %vm53_vm1, %v41_v8 }
 0x104   :  { %v123_v10 = vpop.f32.mrb[0].mxu0 }
 0x105   :  { %v124_v11 = vadd.f32 %v144_v9, %v123_v10  ;;  %v161_v12 = vpop.f32.mrb[1].mxu0 }
 0x107   :  { %127 = vst [vmem:[#allocation7] sm:$0xff] %v124_v11 }
 0x108   :  { %231 = shalt.err (!%p228_p6)
}
 0x109   :  { %s232_s16 = scalar_lea.hbm %s325_s3, 128 }
 0x10a   :  { %p233_p7 = scmp.ne.s32.totalorder %s325_s3, %s232_s16  ;;  %p236_p8 = scmp.lt.u32.totalorder %s232_s16, %s325_s3 }
 0x10c   :  { %p238_p9 = pnand %p236_p8, %p233_p7 }
 0x10e   :  { %241 = shalt.err (!%p238_p9)
}
 0x10f   :  { %137 = dma.vmem_to_hbm [thread:$0]  %s135_s12, 128, %s325_s3, [#allocation4]  }
 0x110   :  { %246 = dma.done.wait [#allocation4], 128  }
 0x111   :  { %247 = vsyncadd [#allocation4], 4294967168 }
 0x112   :  { %141 = vsyncpa [#allocation3], 1 }
 0x113   :  { %142 = vsyncpa [#allocation6], 1 }
 0x114   :  { %143 = vsyncpa [#allocation4], 1 }

</bundles_post_ra>
